<compile_context>
chip_gen: v6e
topology: v6e:2x2x1
jax: 0.10.0
libtpu: 0.0.40
codegen_flags: <defaults>
</compile_context>

<pallas_src>
import functools

import jax
import jax.numpy as jnp
from jax import lax
from jax.experimental import pallas as pl
from jax.experimental.pallas import tpu as pltpu


# ----------------------------- small helpers --------------------------------

def _round_up(x, m):
    return ((x + m - 1) // m) * m


def _device_kind():
    try:
        return jax.devices()[0].device_kind.lower()
    except Exception:
        return ""


def _bf16_transcendentals_ok():
    # bf16 EUP/VPU exists on v6e and newer; keep exps in f32 on v5e and older.
    kind = _device_kind()
    return ("v6" in kind) or ("v7" in kind)


def _vmem_limit_bytes():
    default = 64 * 1024 * 1024
    try:
        cap = int(pltpu.get_tpu_info().vmem_capacity_bytes)
    except Exception:
        return default
    # ~20% headroom for compiler-internal scratch; v6e/v5e -> ~102 MiB,
    # v7x (64 MiB/TC) -> ~51 MiB.
    return max(32 * 1024 * 1024, int(cap * 0.8))


def row_tiling(n, block_rows=None):
    """Pick (row tile, padded row count) for the attention grid."""
    if block_rows is None:
        # v7x has 64 MiB VMEM / TensorCore -> smaller tile; 128 MiB parts -> 512.
        block_rows = 256 if "v7" in _device_kind() else 512
    tm = max(32, min(block_rows, _round_up(n, 32)))
    tm = _round_up(tm, 32)                      # int8 sublane packing
    n_pad = pl.cdiv(n, tm) * tm
    return tm, n_pad


def prepare_adjacency(adj, n_pad):
    """Hoistable per-graph preprocessing: 0/1 int8 adjacency, row/col padded."""
    n = adj.shape[0]
    adj_i8 = (adj > 0).astype(jnp.int8)
    if n_pad > n:
        adj_i8 = jnp.pad(adj_i8, ((0, n_pad - n), (0, n_pad - n)))
    return adj_i8
    # TODO(synk): on v5e, bit-pack adjacency (8 cols/byte) if profiles show the
    # int8 stream at the HBM roofline.


# ------------------------------- kernels -------------------------------------

def _prep_kernel(h_ref, w_ref, a1_ref, a2_ref, wh_ref, wh1_ref, wh2_ref, *,
                 n_real, d_out, fold_denominator):
    # Wh = h @ W  (bf16 MXU inputs, f32 accumulation).
    wh = jnp.dot(h_ref[...].astype(jnp.bfloat16),
                 w_ref[...].astype(jnp.bfloat16),
                 preferred_element_type=jnp.float32)          # [n_pad, d_pad] f32
    # Attention projections as VPU mul + lane reduction (keeps the MXU free and
    # avoids lane-width-1 matmul results).  Done in f32 before the bf16 store.
    wh1_ref[...] = jnp.sum(wh * a1_ref[...], axis=-1, keepdims=True)   # [n_pad,1]
    wh2_ref[...] = jnp.sum(wh * a2_ref[...], axis=-1, keepdims=True)   # [n_pad,1]
    if fold_denominator:
        # Write a column of ones into dead padded feature column `d_out`, but
        # ONLY for real rows (< n_real).  Downstream, ex @ Wh then yields the
        # softmax denominator over real columns for free in that MXU column,
        # which also makes edgeless rows with padded columns exactly match the
        # reference softmax.
        row = lax.broadcasted_iota(jnp.int32, wh.shape, 0)
        col = lax.broadcasted_iota(jnp.int32, wh.shape, 1)
        wh = jnp.where((col == d_out) & (row < n_real), 1.0, wh)
    wh_ref[...] = wh.astype(jnp.bfloat16)


def _attention_kernel(adj_ref, wh_ref, wh1_ref, wh2t_ref, out_ref, *,
                      alpha, n_real, d_out, fold_denominator, exp_dtype):
    # e[i, j] = LeakyReLU(Wh1[i] + Wh2[j]) for this row tile.
    e = wh1_ref[...] + wh2t_ref[...]                       # [TM, n_pad] f32
    e = jnp.maximum(e, alpha * e)                          # LeakyReLU (0<alpha<1)
    # Masked logits; -9e15 matches torch.where(adj > 0, e, -9e15) exactly.
    att = jnp.where(adj_ref[...] != 0, e, -9e15)
    m = jnp.max(att, axis=1, keepdims=True)
    # exp in bf16 on v6e/v7x (args <= 0, result in [0,1]); f32 elsewhere.
    ex = jnp.exp((att - m).astype(exp_dtype))
    # Unnormalized MXU matmul (bf16 operands, f32 accumulation).  Padded rows
    # of Wh are zero so padded columns of `ex` contribute nothing.
    acc = jnp.dot(ex.astype(jnp.bfloat16), wh_ref[...],
                  preferred_element_type=jnp.float32)      # [TM, d_pad] f32
    if fold_denominator:
        # Denominator = ex @ ones-column (column d_out of Wh), i.e. the row-sum
        # over REAL columns, computed for free by the MXU.
        denom = acc[:, d_out:d_out + 1]
    else:
        ex_f32 = ex.astype(jnp.float32)
        if n_real < ex.shape[-1]:
            col = lax.broadcasted_iota(jnp.int32, ex.shape, 1)
            ex_f32 = jnp.where(col < n_real, ex_f32, 0.0)
        denom = jnp.sum(ex_f32, axis=1, keepdims=True)
    # Normalize AFTER the matmul, in f32, with an exact reciprocal.
    out_ref[...] = (acc * pl.reciprocal(denom, approx=False)).astype(out_ref.dtype)
    # TODO(synk): attention dropout skipped (eval mode -> identity).
    # concat=False -> no ELU on the output.
    # TODO(synk): for very large graphs (N >~ 8-16k) add a column grid axis with
    # flash-style online softmax so [TM, N] temporaries stay within VMEM.


# ------------------------------- wrapper --------------------------------------

def _attention_call(kernel, adj_i8, wh_bf16, wh1, wh2t, *, tm, n_pad, d_pad,
                    vmem_limit, single_buffer_residents):
    resident_kwargs = {}
    if single_buffer_residents:
        # Grid-invariant blocks (index_map always (0,0)): no need to double-buffer.
        resident_kwargs = dict(pipeline_mode=pl.Buffered(1))
    return pl.pallas_call(
        kernel,
        out_shape=jax.ShapeDtypeStruct((n_pad, d_pad), jnp.bfloat16),
        grid=(n_pad // tm,),
        in_specs=[
            pl.BlockSpec((tm, n_pad), lambda i: (i, 0)),               # adj (int8)
            pl.BlockSpec((n_pad, d_pad), lambda i: (0, 0),
                         **resident_kwargs),                           # Wh (bf16)
            pl.BlockSpec((tm, 1), lambda i: (i, 0)),                   # Wh1 tile
            pl.BlockSpec((1, n_pad), lambda i: (0, 0),
                         **resident_kwargs),                           # Wh2^T
        ],
        out_specs=pl.BlockSpec((tm, d_pad), lambda i: (i, 0)),
        compiler_params=pltpu.CompilerParams(
            dimension_semantics=("parallel",),   # v7x: shard row tiles on 2 TCs
            vmem_limit_bytes=vmem_limit,
        ),
    )(adj_i8, wh_bf16, wh1, wh2t)


def graphnet_forward(h, adj, W, a, *, alpha, block_rows=None):
    """GAT layer forward (concat=False, eval mode).

    `adj` may be the raw (n, n) float/bool adjacency, or a pre-packed int8
    adjacency of shape (n_pad, n_pad) produced by `prepare_adjacency` (hoists
    the N^2 conversion out of the per-call path for static graphs).
    """
    n, _ = h.shape
    d_out = W.shape[1]

    tm, n_pad = row_tiling(n, block_rows)
    d_pad = _round_up(d_out, 128)                 # lane-dense output
    fold_denominator = d_pad > d_out              # a dead column is available
    exp_dtype = jnp.bfloat16 if _bf16_transcendentals_ok() else jnp.float32
    vmem_limit = _vmem_limit_bytes()

    h_p = jnp.pad(h.astype(jnp.float32), ((0, n_pad - n), (0, 0)))
    w_p = jnp.pad(W.astype(jnp.float32), ((0, 0), (0, d_pad - d_out)))
    a_flat = a.reshape(-1).astype(jnp.float32)
    a1 = jnp.pad(a_flat[:d_out], (0, d_pad - d_out)).reshape(1, d_pad)
    a2 = jnp.pad(a_flat[d_out:], (0, d_pad - d_out)).reshape(1, d_pad)

    if adj.dtype == jnp.int8 and adj.shape == (n_pad, n_pad):
        adj_i8 = adj                               # already packed & padded
    else:
        adj_i8 = prepare_adjacency(adj, n_pad)

    # --- Kernel 1: Wh, attention projections, ones column (tiny, whole-array) --
    prep = functools.partial(_prep_kernel, n_real=n, d_out=d_out,
                             fold_denominator=fold_denominator)
    wh_bf16, wh1, wh2 = pl.pallas_call(
        prep,
        out_shape=(
            jax.ShapeDtypeStruct((n_pad, d_pad), jnp.bfloat16),
            jax.ShapeDtypeStruct((n_pad, 1), jnp.float32),
            jax.ShapeDtypeStruct((n_pad, 1), jnp.float32),
        ),
        in_specs=[pl.BlockSpec(memory_space=pltpu.VMEM)] * 4,
        out_specs=(pl.BlockSpec(memory_space=pltpu.VMEM),) * 3,
    )(h_p, w_p, a1, a2)

    # Layout plumbing only: [n_pad, 1] -> [1, n_pad] row vector.
    wh2t = wh2.reshape(1, n_pad)

    # --- Kernel 2: row-tiled masked softmax + att @ Wh -------------------------
    attn = functools.partial(_attention_kernel, alpha=alpha, n_real=n,
                             d_out=d_out, fold_denominator=fold_denominator,
                             exp_dtype=exp_dtype)
    try:
        out_pad = _attention_call(attn, adj_i8, wh_bf16, wh1, wh2t,
                                  tm=tm, n_pad=n_pad, d_pad=d_pad,
                                  vmem_limit=vmem_limit,
                                  single_buffer_residents=True)
    except Exception:
        # Fallback if this runtime rejects pl.Buffered(1) for resident blocks.
        out_pad = _attention_call(attn, adj_i8, wh_bf16, wh1, wh2t,
                                  tm=tm, n_pad=n_pad, d_pad=d_pad,
                                  vmem_limit=vmem_limit,
                                  single_buffer_residents=False)

    # Small slice + cast back to f32 (torch module returns float32).
    return out_pad[:n, :d_out].astype(jnp.float32)


# ------------------------------- reference ------------------------------------

def _reference(h, adj, W, a, alpha):
    d_out = W.shape[1]
    Wh = h @ W
    e = Wh @ a[:d_out] + (Wh @ a[d_out:]).T
    e = jnp.where(e > 0, e, alpha * e)
    att = jnp.where(adj > 0, e, -9e15)
    att = jax.nn.softmax(att, axis=1)
    return att @ Wh


if __name__ == "__main__":
    key = jax.random.PRNGKey(0)
    k_h, k_w, k_a, k_adj = jax.random.split(key, 4)

    N, input_dim, output_dim = 256, 32, 16
    alpha = 0.2

    h = jax.random.normal(k_h, (N, input_dim), dtype=jnp.float32)

    # Glorot (Xavier uniform) init for weights, deterministic.
    limit = (6.0 / (input_dim + output_dim)) ** 0.5
    W = jax.random.uniform(k_w, (input_dim, output_dim),
                           minval=-limit, maxval=limit, dtype=jnp.float32)
    a = jax.random.uniform(k_a, (2 * output_dim, 1),
                           minval=-0.1, maxval=0.1, dtype=jnp.float32)

    # Random 0/1 adjacency with self-loops.
    adj = (jax.random.uniform(k_adj, (N, N)) > 0.5).astype(jnp.float32)
    adj = jnp.maximum(adj, jnp.eye(N, dtype=jnp.float32))

    # Hoisted per-graph preprocessing (static graph: pack the adjacency once).
    _, n_pad = row_tiling(N)
    adj_packed = prepare_adjacency(adj, n_pad)

    out = graphnet_forward(h, adj_packed, W, a, alpha=alpha)
    out = jax.block_until_ready(out)

    ref = _reference(h, adj, W, a, alpha)
    assert out.shape == ref.shape
    max_err = jnp.max(jnp.abs(out - ref))
    # Tolerance accounts for bf16 MXU operands / bf16 exp / bf16 writeback.
    assert jnp.allclose(out, ref, atol=5e-2, rtol=5e-2), (
        f"mismatch vs reference: max abs err {max_err:.3e}")

    print("KERNEL_OK")
</pallas_src>

<mosaic_0001>
module attributes {stable_mosaic.version = 11 : i64} {
  func.func @_prep_kernel(%arg0: memref<256x32xf32, #tpu.memory_space<vmem>>, %arg1: memref<32x128xf32, #tpu.memory_space<vmem>>, %arg2: memref<1x128xf32, #tpu.memory_space<vmem>>, %arg3: memref<1x128xf32, #tpu.memory_space<vmem>>, %arg4: memref<256x128xbf16, #tpu.memory_space<vmem>>, %arg5: memref<256x1xf32, #tpu.memory_space<vmem>>, %arg6: memref<256x1xf32, #tpu.memory_space<vmem>>) attributes {dimension_semantics = [], scalar_prefetch = 0 : i64, scratch_operands = 0 : i64, tpu.core_type = #tpu.core_type<tc>} {
    %c0 = arith.constant 0 : index
    %c0_0 = arith.constant 0 : index
    %0 = vector.load %arg0[%c0, %c0_0] : memref<256x32xf32, #tpu.memory_space<vmem>>, vector<256x32xf32>
    %1 = arith.truncf %0 : vector<256x32xf32> to vector<256x32xbf16>
    %c0_1 = arith.constant 0 : index
    %c0_2 = arith.constant 0 : index
    %2 = vector.load %arg1[%c0_1, %c0_2] : memref<32x128xf32, #tpu.memory_space<vmem>>, vector<32x128xf32>
    %3 = arith.truncf %2 : vector<32x128xf32> to vector<32x128xbf16>
    %cst = arith.constant dense<0.000000e+00> : vector<256x128xf32>
    %4 = tpu.matmul %1, %3, %cst {dimension_numbers = #tpu.dot_dimension_numbers<[1], [0], [0], [1], [0, 0, 1, 1], [], []>} : vector<256x32xbf16>, vector<32x128xbf16>, vector<256x128xf32> -> vector<256x128xf32>
    %c0_3 = arith.constant 0 : index
    %c0_4 = arith.constant 0 : index
    %5 = vector.load %arg2[%c0_3, %c0_4] : memref<1x128xf32, #tpu.memory_space<vmem>>, vector<1x128xf32>
    %6 = vector.broadcast %5 : vector<1x128xf32> to vector<256x128xf32>
    %7 = arith.mulf %4, %6 : vector<256x128xf32>
    %cst_5 = arith.constant dense<0.000000e+00> : vector<256xf32>
    %8 = vector.multi_reduction <add>, %7, %cst_5 [1] : vector<256x128xf32> to vector<256xf32>
    %9 = vector.shape_cast %8 : vector<256xf32> to vector<256x1xf32>
    %c0_6 = arith.constant 0 : index
    %c0_7 = arith.constant 0 : index
    %10 = vector.load %arg5[%c0_6, %c0_7] : memref<256x1xf32, #tpu.memory_space<vmem>>, vector<256x1xf32>
    tpu.vector_store %arg5[%c0_6, %c0_7], %9 {strides = array<i32>} : memref<256x1xf32, #tpu.memory_space<vmem>>, vector<256x1xf32>,
    %c0_8 = arith.constant 0 : index
    %c0_9 = arith.constant 0 : index
    %11 = vector.load %arg3[%c0_8, %c0_9] : memref<1x128xf32, #tpu.memory_space<vmem>>, vector<1x128xf32>
    %12 = vector.broadcast %11 : vector<1x128xf32> to vector<256x128xf32>
    %13 = arith.mulf %4, %12 : vector<256x128xf32>
    %cst_10 = arith.constant dense<0.000000e+00> : vector<256xf32>
    %14 = vector.multi_reduction <add>, %13, %cst_10 [1] : vector<256x128xf32> to vector<256xf32>
    %15 = vector.shape_cast %14 : vector<256xf32> to vector<256x1xf32>
    %c0_11 = arith.constant 0 : index
    %c0_12 = arith.constant 0 : index
    %16 = vector.load %arg6[%c0_11, %c0_12] : memref<256x1xf32, #tpu.memory_space<vmem>>, vector<256x1xf32>
    tpu.vector_store %arg6[%c0_11, %c0_12], %15 {strides = array<i32>} : memref<256x1xf32, #tpu.memory_space<vmem>>, vector<256x1xf32>,
    %17 = tpu.iota {dimensions = array<i32: 0>} : vector<256x128xi32>
    %18 = tpu.iota {dimensions = array<i32: 1>} : vector<256x128xi32>
    %c16_i32 = arith.constant 16 : i32
    %19 = vector.broadcast %c16_i32 : i32 to vector<256x128xi32>
    %20 = arith.cmpi eq, %18, %19 : vector<256x128xi32>
    %c256_i32 = arith.constant 256 : i32
    %21 = vector.broadcast %c256_i32 : i32 to vector<256x128xi32>
    %22 = arith.cmpi slt, %17, %21 : vector<256x128xi32>
    %23 = arith.andi %20, %22 : vector<256x128xi1>
    %cst_13 = arith.constant 1.000000e+00 : f32
    %24 = vector.broadcast %cst_13 : f32 to vector<256x128xf32>
    %25 = arith.select %23, %24, %4 : vector<256x128xi1>, vector<256x128xf32>
    %26 = arith.truncf %25 : vector<256x128xf32> to vector<256x128xbf16>
    %c0_14 = arith.constant 0 : index
    %c0_15 = arith.constant 0 : index
    %27 = vector.load %arg4[%c0_14, %c0_15] : memref<256x128xbf16, #tpu.memory_space<vmem>>, vector<256x128xbf16>
    tpu.vector_store %arg4[%c0_14, %c0_15], %26 {strides = array<i32>} : memref<256x128xbf16, #tpu.memory_space<vmem>>, vector<256x128xbf16>,
    return
  }
}

</mosaic_0001>

<bundles_post_ra>
// kernel: tpu_custom_call.1
= control target key start
LH: loop header
LB: loop body
LE: loop exit
PB: predicated region body
PF: predicated region fallthrough
CT: control target
= control target key end

     0   :  { %vm76_vm0 = vcmask 261120   ;;  %s1853_s0 = inlined_call_operand.vmem [shape: f32[256,32], index: 0, kind: input, shape index: {}]   ;;  %s1854_s1 = inlined_call_operand.vmem [shape: f32[32,128], index: 1, kind: input, shape index: {}]   ;;  %s1855_s2 = inlined_call_operand.vmem [shape: f32[1,128], index: 2, kind: input, shape index: {}]   ;;  %s1856_s3 = inlined_call_operand.vmem [shape: f32[1,128], index: 3, kind: input, shape index: {}]   ;;  %s1857_s4 = inlined_call_operand.hbm [shape: bf16[256,128], index: 4, kind: output, shape index: {0}]   ;;  %s1858_s5 = inlined_call_operand.vmem [shape: f32[256,1], index: 5, kind: output, shape index: {1}]   ;;  %s1859_s6 = inlined_call_operand.vmem [shape: f32[256,1], index: 6, kind: output, shape index: {2}]  }
   0x1   :  { %v72_v0 = vld [vmem:[%s1854_s1 + $0x10] sm:$0xff]  ;;  %v73_v1 = vld [vmem:[%s1854_s1 + $0x18] sm:$0xff]  ;;  %v70_v2 = vld [vmem:[%s1854_s1] sm:$0xff] }
   0x2   :  { %v75_v3 = vpack.c.bf16 %v73_v1, %v72_v0  ;;  %v71_v4 = vld [vmem:[%s1854_s1 + $0x8] sm:$0xff]  ;;  %v22_v5 = vld [vmem:[%s1853_s0] sm:$0xff]  ;;  %v24_v12 = vld [vmem:[%s1853_s0 + $0x10] sm:$0xff] }
   0x3   :  { %v23_v6 = vld [vmem:[%s1853_s0 + $0x8] sm:$0xff]  ;;  %v74_v7 = vpack.c.bf16 %v71_v4, %v70_v2  ;;  %v38_v9 = vld [vmem:[%s1853_s0 + $0x80] sm:$0xff]  ;;  %v25_v13 = vld [vmem:[%s1853_s0 + $0x18] sm:$0xff] }
   0x4   :  { %v54_v8 = vpack.c.bf16 %v23_v6, %v22_v5  ;;  %v39_v10 = vld [vmem:[%s1853_s0 + $0x88] sm:$0xff]  ;;  %1068 = vmatprep.subr.bf16.mxu0 %v75_v3  ;;  %1104 = vmatprep.subr.bf16.mxu1 %v75_v3  ;;  %v40_v14 = vld [vmem:[%s1853_s0 + $0x90] sm:$0xff]  ;;  %v41_v15 = vld [vmem:[%s1853_s0 + $0x98] sm:$0xff]  ;;  %v55_v20 = vpack.c.bf16 %v25_v13, %v24_v12 }
   0x5   :  { %v62_v11 = vpack.c.bf16 %v39_v10, %v38_v9  ;;  %1069 = vmatpush3.bf16.msra.mxu0 %v75_v3  ;;  %1106 = vmatpush3.bf16.msra.mxu1 %v75_v3  ;;  %v26_v16 = vld [vmem:[%s1853_s0 + $0x20] sm:$0xff]  ;;  %v27_v17 = vld [vmem:[%s1853_s0 + $0x28] sm:$0xff]  ;;  %v63_v21 = vpack.c.bf16 %v41_v15, %v40_v14  ;;  %v28_v24 = vld [vmem:[%s1853_s0 + $0x30] sm:$0xff] }
   0x6   :  { %1070 = vmatprep.subr.bf16.mxu0 %v74_v7  ;;  %1105 = vmatprep.subr.bf16.mxu1 %v74_v7  ;;  %v42_v18 = vld [vmem:[%s1853_s0 + $0xa0] sm:$0xff]  ;;  %v43_v19 = vld [vmem:[%s1853_s0 + $0xa8] sm:$0xff]  ;;  %v56_v22 = vpack.c.bf16 %v27_v17, %v26_v16  ;;  %v29_v25 = vld [vmem:[%s1853_s0 + $0x38] sm:$0xff] }
   0x7   :  { %1072 = vmatprep.mubr.msk.bf16.mxu0 %vm76_vm0, %v54_v8  ;;  %1088 = vmatprep.mubr.msk.bf16.mxu1 %vm76_vm0, %v62_v11  ;;  %v64_v23 = vpack.c.bf16 %v43_v19, %v42_v18  ;;  %v44_v26 = vld [vmem:[%s1853_s0 + $0xb0] sm:$0xff]  ;;  %v45_v27 = vld [vmem:[%s1853_s0 + $0xb8] sm:$0xff]  ;;  %v30_v28 = vld [vmem:[%s1853_s0 + $0x40] sm:$0xff] }
   0x9   :  { %1071 = vmatpush3.bf16.msra.mxu0 %v74_v7  ;;  %1107 = vmatpush3.bf16.msra.mxu1 %v74_v7 }
   0xc   :  { %1073 = vmatmul.mubr.msk.bf16.vlgmr.msra.gmra.mxu0 %vm76_vm0, %v55_v20  ;;  %1089 = vmatmul.mubr.msk.bf16.vlgmr.msra.gmra.mxu1 %vm76_vm0, %v63_v21 }
   0xd   :  { %1076 = vmatprep.mubr.msk.bf16.mxu0 %vm76_vm0, %v56_v22  ;;  %1092 = vmatprep.mubr.msk.bf16.mxu1 %vm76_vm0, %v64_v23 }
   0xe   :  { %12 = vsyncpa [#allocation3], 0  ;;  %v31_v29 = vld [vmem:[%s1853_s0 + $0x48] sm:$0xff]  ;;  %v46_v30 = vld [vmem:[%s1853_s0 + $0xc0] sm:$0xff]  ;;  %v57_v32 = vpack.c.bf16 %v29_v25, %v28_v24  ;;  %v65_v33 = vpack.c.bf16 %v45_v27, %v44_v26  ;;  %v590_v54 = vlaneseq  ;;  %vm389_vm2 = vcmask 7168  }
   0xf   :  { %v47_v31 = vld [vmem:[%s1853_s0 + $0xc8] sm:$0xff]  ;;  %v58_v34 = vpack.c.bf16 %v31_v29, %v30_v28  ;;  %v32_v36 = vld [vmem:[%s1853_s0 + $0x50] sm:$0xff]  ;;  %v33_v37 = vld [vmem:[%s1853_s0 + $0x58] sm:$0xff] }
  0x10   :  { %v66_v35 = vpack.c.bf16 %v47_v31, %v46_v30  ;;  %v48_v38 = vld [vmem:[%s1853_s0 + $0xd0] sm:$0xff]  ;;  %v49_v39 = vld [vmem:[%s1853_s0 + $0xd8] sm:$0xff]  ;;  %v34_v40 = vld [vmem:[%s1853_s0 + $0x60] sm:$0xff]  ;;  %v59_v44 = vpack.c.bf16 %v33_v37, %v32_v36  ;;  %v1295_v55 = vand.u32 127, %v590_v54 }
  0x11   :  { %v35_v41 = vld [vmem:[%s1853_s0 + $0x68] sm:$0xff]  ;;  %v50_v42 = vld [vmem:[%s1853_s0 + $0xe0] sm:$0xff]  ;;  %v67_v45 = vpack.c.bf16 %v49_v39, %v48_v38  ;;  %v36_v48 = vld [vmem:[%s1853_s0 + $0x70] sm:$0xff] }
  0x12   :  { %v51_v43 = vld [vmem:[%s1853_s0 + $0xe8] sm:$0xff]  ;;  %v60_v46 = vpack.c.bf16 %v35_v41, %v34_v40  ;;  %v37_v49 = vld [vmem:[%s1853_s0 + $0x78] sm:$0xff]  ;;  %v52_v50 = vld [vmem:[%s1853_s0 + $0xf0] sm:$0xff]  ;;  %vm592_vm1 = vcmp.eq.s32.totalorder %v1295_v55, 16 }
  0x13   :  { %v68_v47 = vpack.c.bf16 %v51_v43, %v50_v42  ;;  %v53_v51 = vld [vmem:[%s1853_s0 + $0xf8] sm:$0xff]  ;;  %v61_v52 = vpack.c.bf16 %v37_v49, %v36_v48  ;;  %v1300_v56 = vld [vmem:[%s1855_s2] ss:$0 sm:$0xff]  ;;  %s1133_s2 = smov [#allocation2]  }
  0x14   :  { %1077 = vmatmul.mubr.msk.bf16.gmra.mxu0 %vm76_vm0, %v57_v32  ;;  %1093 = vmatmul.mubr.msk.bf16.gmra.mxu1 %vm76_vm0, %v65_v33  ;;  %v69_v53 = vpack.c.bf16 %v53_v51, %v52_v50  ;;  %v1312_v63 = vld [vmem:[%s1856_s3] ss:$0 sm:$0xff]  ;;  %s854_s3 = sshll.u32 %s1133_s2, 4  ;;  %s855_s3 = int_to_ptr.vmem [resolvable:$true] %s854_s3 }
  0x15   :  { %1080 = vmatprep.mubr.msk.bf16.mxu0 %vm76_vm0, %v58_v34  ;;  %1096 = vmatprep.mubr.msk.bf16.mxu1 %vm76_vm0, %v66_v35  ;;  %s1111_s21 = scalar_lea.vmem %s855_s3, 2048  ;;  %p1116_p1 = scmp.lt.s32.totalorder %s855_s3, %s855_s3 }
  0x16   :  { %p1112_p0 = scmp.ne.s32.totalorder %s855_s3, %s1111_s21  ;;  %p1117_p2 = scmp.lt.s32.totalorder %s1111_s21, %s1111_s21 }
  0x18   :  { %p1118_p3 = por %p1117_p2, %p1116_p1 }
  0x1a   :  { %p1119_p4 = pnand %p1118_p3, %p1112_p0 }
  0x1c   :  { %1081 = vmatmul.mubr.msk.bf16.gmra.mxu0 %vm76_vm0, %v59_v44  ;;  %1097 = vmatmul.mubr.msk.bf16.gmra.mxu1 %vm76_vm0, %v67_v45 }
  0x1d   :  { %1084 = vmatprep.mubr.msk.bf16.mxu0 %vm76_vm0, %v60_v46  ;;  %1100 = vmatprep.mubr.msk.bf16.mxu1 %vm76_vm0, %v68_v47 }
  0x24   :  { %1085 = vmatmul.mubr.msk.bf16.gmra.mxu0 %vm76_vm0, %v61_v52  ;;  %1101 = vmatmul.mubr.msk.bf16.gmra.mxu1 %vm76_vm0, %v69_v53 }
  0xcc   :  { %v1074_v57 = vpop.f32.mrf.mxu0  ;;  %v1090_v58 = vpop.f32.mrf.mxu1 }
  0xcd   :  { %v311_v59 = vmul.f32 %v1090_v58, %v1300_v56  ;;  %v295_v60 = vmul.f32 %v1074_v57, %v1300_v56  ;;  %v659_v0 = vsel %vm592_vm1, 1.0, %v1074_v57  ;;  %v675_v1 = vsel %vm592_vm1, 1.0, %v1090_v58 }
  0xce   :  { %v1305_v61 = vpop.f32.mrf.mxu0  ;;  %v1307_v62 = vpop.f32.mrf.mxu1  ;;  %v431_v6 = vmul.f32 %v1074_v57, %v1312_v63  ;;  %v447_v20 = vmul.f32 %v1090_v58, %v1312_v63 }
  0xcf   :  { %361 = vadd.xlane.f32.xlu0 %v311_v59  ;;  %329 = vadd.xlane.f32.xlu1 %v295_v60  ;;  %v657_v12 = vsel %vm592_vm1, 1.0, %v1305_v61  ;;  %v673_v13 = vsel %vm592_vm1, 1.0, %v1307_v62  ;;  %v293_v26 = vmul.f32 %v1300_v56, %v1305_v61  ;;  %v309_v44 = vmul.f32 %v1300_v56, %v1307_v62 }
  0xd0   :  { %v1075_v2 = vpop.f32.mrf.mxu0  ;;  %v1091_v3 = vpop.f32.mrf.mxu1  ;;  %v429_v51 = vmul.f32 %v1312_v63, %v1305_v61 }
  0xd1   :  { %v660_v4 = vsel %vm592_vm1, 1.0, %v1075_v2  ;;  %v676_v5 = vsel %vm592_vm1, 1.0, %v1091_v3  ;;  %v296_v7 = vmul.f32 %v1075_v2, %v1300_v56  ;;  %v312_v21 = vmul.f32 %v1091_v3, %v1300_v56 }
  0xd2   :  { %v963_v8 = vpack.c.bf16 %v660_v4, %v659_v0  ;;  %v1003_v9 = vpack.c.bf16 %v676_v5, %v675_v1  ;;  %v1324_v10 = vpop.f32.mrf.mxu0  ;;  %v1326_v11 = vpop.f32.mrf.mxu1  ;;  %v432_v27 = vmul.f32 %v1075_v2, %v1312_v63  ;;  %v448_v45 = vmul.f32 %v1091_v3, %v1312_v63 }
  0xd3   :  { %v658_v14 = vsel %vm592_vm1, 1.0, %v1324_v10  ;;  %v674_v15 = vsel %vm592_vm1, 1.0, %v1326_v11  ;;  %465 = vadd.xlane.f32.xlu0 %v431_v6  ;;  %331 = vadd.xlane.f32.xlu1 %v296_v7  ;;  %v310_v52 = vmul.f32 %v1300_v56, %v1326_v11 }
  0xd4   :  { %1035 = vst [vmem:[#allocation2 + $0x8] sm:$0xff] %v963_v8   ;;  %1043 = vst [vmem:[#allocation2 + $0x48] sm:$0xff] %v1003_v9   ;;  %v958_v16 = vpack.c.bf16 %v658_v14, %v657_v12  ;;  %v998_v17 = vpack.c.bf16 %v674_v15, %v673_v13  ;;  %v1340_v18 = vpop.f32.mrf.mxu0  ;;  %v1342_v19 = vpop.f32.mrf.mxu1  ;;  %v445_v15 = vmul.f32 %v1312_v63, %v1307_v62 }
  0xd5   :  { %v663_v24 = vsel %vm592_vm1, 1.0, %v1340_v18  ;;  %v679_v25 = vsel %vm592_vm1, 1.0, %v1342_v19  ;;  %v299_v55 = vmul.f32 %v1340_v18, %v1300_v56 }
  0xd6   :  { %959 = vst [vmem:[#allocation2] sm:$0xff] %v958_v16   ;;  %1042 = vst [vmem:[#allocation2 + $0x40] sm:$0xff] %v998_v17   ;;  %v1346_v22 = vpop.f32.mrf.mxu0  ;;  %v1348_v23 = vpop.f32.mrf.mxu1  ;;  %v430_v16 = vmul.f32 %v1312_v63, %v1324_v10 }
  0xd7   :  { %497 = vadd.xlane.f32.xlu0 %v447_v20  ;;  %363 = vadd.xlane.f32.xlu1 %v312_v21  ;;  %v661_v30 = vsel %vm592_vm1, 1.0, %v1346_v22  ;;  %v677_v32 = vsel %vm592_vm1, 1.0, %v1348_v23  ;;  %v446_v21 = vmul.f32 %v1312_v63, %v1326_v11 }
  0xd8   :  { %v1359_v28 = vpop.f32.mrf.mxu0  ;;  %v1361_v29 = vpop.f32.mrf.mxu1 }
  0xd9   :  { %v664_v31 = vsel %vm592_vm1, 1.0, %v1359_v28  ;;  %v680_v33 = vsel %vm592_vm1, 1.0, %v1361_v29 }
  0xda   :  { %v973_v34 = vpack.c.bf16 %v664_v31, %v663_v24  ;;  %v1375_v35 = vpop.f32.mrf.mxu0  ;;  %v1013_v36 = vpack.c.bf16 %v680_v33, %v679_v25  ;;  %v1377_v37 = vpop.f32.mrf.mxu1  ;;  %v294_v24 = vmul.f32 %v1300_v56, %v1324_v10 }
  0xdb   :  { %325 = vadd.xlane.f32.xlu0 %v293_v26  ;;  %467 = vadd.xlane.f32.xlu1 %v432_v27  ;;  %v662_v38 = vsel %vm592_vm1, 1.0, %v1375_v35  ;;  %v678_v39 = vsel %vm592_vm1, 1.0, %v1377_v37 }
  0xdc   :  { %1037 = vst [vmem:[#allocation2 + $0x18] sm:$0xff] %v973_v34   ;;  %v968_v40 = vpack.c.bf16 %v662_v38, %v661_v30  ;;  %1045 = vst [vmem:[#allocation2 + $0x58] sm:$0xff] %v1013_v36   ;;  %v1008_v41 = vpack.c.bf16 %v678_v39, %v677_v32  ;;  %v1385_v42 = vpop.f32.mrf.mxu0  ;;  %v1387_v43 = vpop.f32.mrf.mxu1 }
  0xdd   :  { %v667_v48 = vsel %vm592_vm1, 1.0, %v1385_v42  ;;  %v683_v49 = vsel %vm592_vm1, 1.0, %v1387_v43 }
  0xde   :  { %1036 = vst [vmem:[#allocation2 + $0x10] sm:$0xff] %v968_v40   ;;  %1044 = vst [vmem:[#allocation2 + $0x50] sm:$0xff] %v1008_v41   ;;  %v1392_v46 = vpop.f32.mrf.mxu0  ;;  %v255_v47 = vpop.f32.mrf.mxu1 }
  0xdf   :  { %357 = vadd.xlane.f32.xlu0 %v309_v44  ;;  %499 = vadd.xlane.f32.xlu1 %v448_v45  ;;  %v1401_v50 = vmul.f32 %v1300_v56, %v255_v47  ;;  %v1413_v57 = vmul.f32 %v1312_v63, %v1392_v46  ;;  %v1416_v58 = vmul.f32 %v1312_v63, %v255_v47  ;;  %v665_v59 = vsel %vm592_vm1, 1.0, %v1392_v46 }
  0xe0   :  { %v1407_v53 = vpop.f32.mrf.mxu0  ;;  %v1409_v54 = vpop.f32.mrf.mxu1  ;;  %v681_v61 = vsel %vm592_vm1, 1.0, %v255_v47 }
  0xe1   :  { %v668_v60 = vsel %vm592_vm1, 1.0, %v1407_v53  ;;  %v684_v0 = vsel %vm592_vm1, 1.0, %v1409_v54 }
  0xe2   :  { %v983_v1 = vpack.c.bf16 %v668_v60, %v667_v48  ;;  %v1429_v2 = vpop.f32.mrf.mxu0  ;;  %v1023_v3 = vpack.c.bf16 %v684_v0, %v683_v49  ;;  %v1431_v4 = vpop.f32.mrf.mxu1 }
  0xe3   :  { %461 = vadd.xlane.f32.xlu0 %v429_v51  ;;  %359 = vadd.xlane.f32.xlu1 %v310_v52  ;;  %v666_v5 = vsel %vm592_vm1, 1.0, %v1429_v2  ;;  %v682_v6 = vsel %vm592_vm1, 1.0, %v1431_v4  ;;  %v1441_v13 = vmul.f32 %v1312_v63, %v1429_v2  ;;  %v1445_v14 = vmul.f32 %v1312_v63, %v1431_v4 }
  0xe4   :  { %1039 = vst [vmem:[#allocation2 + $0x28] sm:$0xff] %v983_v1   ;;  %v978_v7 = vpack.c.bf16 %v666_v5, %v665_v59  ;;  %1047 = vst [vmem:[#allocation2 + $0x68] sm:$0xff] %v1023_v3   ;;  %v1018_v8 = vpack.c.bf16 %v682_v6, %v681_v61  ;;  %v1086_v9 = vpop.f32.mrf.mxu0  ;;  %v1102_v12 = vpop.f32.mrf.mxu1 }
  0xe5   :  { %v1452_v17 = vmul.f32 %v1086_v9, %v1300_v56  ;;  %v1455_v20 = vmul.f32 %v1102_v12, %v1300_v56  ;;  %v1462_v62 = vmul.f32 %v1086_v9, %v1312_v63  ;;  %v1465_v27 = vmul.f32 %v1102_v12, %v1312_v63 }
  0xe6   :  { %1038 = vst [vmem:[#allocation2 + $0x20] sm:$0xff] %v978_v7   ;;  %1046 = vst [vmem:[#allocation2 + $0x60] sm:$0xff] %v1018_v8   ;;  %v207_v25 = vpop.f32.mrf.mxu0  ;;  %v271_v26 = vpop.f32.mrf.mxu1  ;;  %v671_v30 = vsel %vm592_vm1, 1.0, %v1086_v9  ;;  %v687_v11 = vsel %vm592_vm1, 1.0, %v1102_v12  ;;  %v300_v8 = vmul.f32 %v1359_v28, %v1300_v56  ;;  %v315_v9 = vmul.f32 %v1342_v19, %v1300_v56 }
  0xe7   :  { %493 = vadd.xlane.f32.xlu0 %v445_v15  ;;  %463 = vadd.xlane.f32.xlu1 %v430_v16  ;;  %v1472_v10 = vmul.f32 %v1300_v56, %v207_v25  ;;  %v1475_v31 = vmul.f32 %v1300_v56, %v271_v26  ;;  %v669_v32 = vsel %vm592_vm1, 1.0, %v207_v25  ;;  %v685_v34 = vsel %vm592_vm1, 1.0, %v271_v26 }
  0xe8   :  { %v1087_v33 = vpop.f32.mrf.mxu0  ;;  %v1103_v36 = vpop.f32.mrf.mxu1  ;;  %v1482_v38 = vmul.f32 %v1312_v63, %v207_v25  ;;  %v1485_v39 = vmul.f32 %v1312_v63, %v271_v26  ;;  %v316_v12 = vmul.f32 %v1361_v29, %v1300_v56  ;;  %v435_v15 = vmul.f32 %v1340_v18, %v1312_v63 }
  0xe9   :  { %v672_v40 = vsel %vm592_vm1, 1.0, %v1087_v33  ;;  %v688_v41 = vsel %vm592_vm1, 1.0, %v1103_v36  ;;  %v1492_v44 = vmul.f32 %v1087_v33, %v1300_v56  ;;  %v1495_v45 = vmul.f32 %v1103_v36, %v1300_v56 }
  0xea   :  { %v993_v47 = vpack.c.bf16 %v672_v40, %v671_v30  ;;  %v210_v48 = vpop.f32.mrf.mxu0  ;;  %v1033_v49 = vpack.c.bf16 %v688_v41, %v687_v11  ;;  %v274_v51 = vpop.f32.mrf.mxu1  ;;  %v1498_v52 = vmul.f32 %v1087_v33, %v1312_v63  ;;  %v1501_v59 = vmul.f32 %v1103_v36, %v1312_v63 }
  0xeb   :  { %495 = vadd.xlane.f32.xlu1 %v446_v21  ;;  %327 = vadd.xlane.f32.xlu0 %v294_v24  ;;  %v670_v60 = vsel %vm592_vm1, 1.0, %v210_v48  ;;  %v686_v61 = vsel %vm592_vm1, 1.0, %v274_v51  ;;  %v1508_v0 = vmul.f32 %v1300_v56, %v210_v48  ;;  %v1511_v1 = vmul.f32 %v1300_v56, %v274_v51 }
  0xec   :  { %1041 = vst [vmem:[#allocation2 + $0x38] sm:$0xff] %v993_v47   ;;  %v988_v3 = vpack.c.bf16 %v670_v60, %v669_v32  ;;  %1049 = vst [vmem:[#allocation2 + $0x78] sm:$0xff] %v1033_v49   ;;  %v1028_v5 = vpack.c.bf16 %v686_v61, %v685_v34  ;;  %v1514_v6 = vmul.f32 %v1312_v63, %v210_v48 }
  0xed   :  { %v1517_v7 = vmul.f32 %v1312_v63, %v274_v51  ;;  %v436_v16 = vmul.f32 %v1359_v28, %v1312_v63  ;;  %v451_v21 = vmul.f32 %v1342_v19, %v1312_v63  ;;  %v452_v24 = vmul.f32 %v1361_v29, %v1312_v63 }
  0xee   :  { %1040 = vst [vmem:[#allocation2 + $0x30] sm:$0xff] %v988_v3   ;;  %1048 = vst [vmem:[#allocation2 + $0x70] sm:$0xff] %v1028_v5   ;;  %v297_v25 = vmul.f32 %v1300_v56, %v1346_v22  ;;  %v298_v26 = vmul.f32 %v1300_v56, %v1375_v35  ;;  %v313_v18 = vmul.f32 %v1300_v56, %v1348_v23 }
  0xef   :  { %337 = vadd.xlane.f32.xlu0 %v299_v55  ;;  %339 = vadd.xlane.f32.xlu1 %v300_v8  ;;  %v314_v28 = vmul.f32 %v1300_v56, %v1377_v37  ;;  %v433_v19 = vmul.f32 %v1312_v63, %v1346_v22  ;;  %v434_v29 = vmul.f32 %v1312_v63, %v1375_v35 }
  0xf0   :  { %v449_v30 = vmul.f32 %v1312_v63, %v1348_v23  ;;  %v450_v11 = vmul.f32 %v1312_v63, %v1377_v37  ;;  %v303_v32 = vmul.f32 %v1385_v42, %v1300_v56  ;;  %v304_v33 = vmul.f32 %v1407_v53, %v1300_v56 }
  0xf1   :  { %v319_v22 = vmul.f32 %v1387_v43, %v1300_v56  ;;  %v320_v35 = vmul.f32 %v1409_v54, %v1300_v56  ;;  %v439_v23 = vmul.f32 %v1385_v42, %v1312_v63  ;;  %v440_v37 = vmul.f32 %v1407_v53, %v1312_v63 }
  0xf2   :  { %v455_v34 = vmul.f32 %v1387_v43, %v1312_v63  ;;  %v456_v36 = vmul.f32 %v1409_v54, %v1312_v63  ;;  %v301_v40 = vmul.f32 %v1300_v56, %v1392_v46  ;;  %v302_v41 = vmul.f32 %v1300_v56, %v1429_v2 }
  0xf3   :  { %369 = vadd.xlane.f32.xlu0 %v315_v9  ;;  %371 = vadd.xlane.f32.xlu1 %v316_v12  ;;  %v318_v42 = vmul.f32 %v1300_v56, %v1431_v4 }
  0xf7   :  { %473 = vadd.xlane.f32.xlu0 %v435_v15  ;;  %475 = vadd.xlane.f32.xlu1 %v436_v16 }
  0xfb   :  { %505 = vadd.xlane.f32.xlu0 %v451_v21  ;;  %507 = vadd.xlane.f32.xlu1 %v452_v24 }
  0xff   :  { %333 = vadd.xlane.f32.xlu0 %v297_v25  ;;  %335 = vadd.xlane.f32.xlu1 %v298_v26 }
 0x103   :  { %365 = vadd.xlane.f32.xlu0 %v313_v18  ;;  %367 = vadd.xlane.f32.xlu1 %v314_v28 }
 0x107   :  { %469 = vadd.xlane.f32.xlu0 %v433_v19  ;;  %471 = vadd.xlane.f32.xlu1 %v434_v29 }
 0x10b   :  { %501 = vadd.xlane.f32.xlu0 %v449_v30  ;;  %503 = vadd.xlane.f32.xlu1 %v450_v11 }
 0x10f   :  { %345 = vadd.xlane.f32.xlu0 %v303_v32  ;;  %347 = vadd.xlane.f32.xlu1 %v304_v33 }
 0x113   :  { %377 = vadd.xlane.f32.xlu0 %v319_v22  ;;  %379 = vadd.xlane.f32.xlu1 %v320_v35 }
 0x117   :  { %481 = vadd.xlane.f32.xlu0 %v439_v23  ;;  %483 = vadd.xlane.f32.xlu1 %v440_v37 }
 0x11b   :  { %513 = vadd.xlane.f32.xlu0 %v455_v34  ;;  %515 = vadd.xlane.f32.xlu1 %v456_v36 }
 0x11f   :  { %341 = vadd.xlane.f32.xlu0 %v301_v40  ;;  %343 = vadd.xlane.f32.xlu1 %v302_v41 }
 0x123   :  { %373 = vadd.xlane.f32.xlu0 %v1401_v50  ;;  %375 = vadd.xlane.f32.xlu1 %v318_v42 }
 0x127   :  { %477 = vadd.xlane.f32.xlu0 %v1413_v57  ;;  %479 = vadd.xlane.f32.xlu1 %v1441_v13 }
 0x12b   :  { %509 = vadd.xlane.f32.xlu0 %v1416_v58  ;;  %511 = vadd.xlane.f32.xlu1 %v1445_v14 }
 0x12f   :  { %353 = vadd.xlane.f32.xlu0 %v1452_v17  ;;  %355 = vadd.xlane.f32.xlu1 %v1492_v44 }
 0x133   :  { %385 = vadd.xlane.f32.xlu0 %v1455_v20  ;;  %387 = vadd.xlane.f32.xlu1 %v1495_v45 }
 0x137   :  { %489 = vadd.xlane.f32.xlu0 %v1462_v62  ;;  %491 = vadd.xlane.f32.xlu1 %v1498_v52 }
 0x13b   :  { %349 = vadd.xlane.f32.xlu0 %v1472_v10  ;;  %351 = vadd.xlane.f32.xlu1 %v1508_v0 }
 0x13f   :  { %381 = vadd.xlane.f32.xlu0 %v1475_v31  ;;  %383 = vadd.xlane.f32.xlu1 %v1511_v1 }
 0x143   :  { %485 = vadd.xlane.f32.xlu0 %v1482_v38  ;;  %487 = vadd.xlane.f32.xlu1 %v1514_v6 }
 0x147   :  { %517 = vadd.xlane.f32.xlu0 %v1485_v39  ;;  %519 = vadd.xlane.f32.xlu1 %v1517_v7 }
 0x14b   :  { %521 = vadd.xlane.f32.xlu0 %v1465_v27  ;;  %523 = vadd.xlane.f32.xlu1 %v1501_v59 }
 0x14c   :  { %1122 = shalt.err (!%p1119_p4)
}
 0x14d   :  { %s1134_s22 = smov 64   ;;  %s1135_s23 = smov 4  }
 0x14e   :  { %860 = dma.vmem_to_hbm [thread:$0]  %s855_s3, 2048, %s1857_s4, [#allocation3], %s1134_s22, %s1134_s22, %s1135_s23  }
 0x158   :  { %v362_v56 = vpop.xlane.xlu0 %361  ;;  %v330_v63 = vpop.xlane.xlu1 %329 }
 0x159   :  { %408 = vst.msk [vmem:[%s1858_s5 + $0x90] sm:$0xff] %vm389_vm2, %v362_v56  ;;  %392 = vst.msk [vmem:[%s1858_s5 + $0x10] sm:$0xff] %vm389_vm2, %v330_v63 }
 0x15c   :  { %v466_v43 = vpop.xlane.xlu0 %465  ;;  %v332_v46 = vpop.xlane.xlu1 %331 }
 0x15d   :  { %527 = vst.msk [vmem:[%s1859_s6 + $0x10] sm:$0xff] %vm389_vm2, %v466_v43  ;;  %393 = vst.msk [vmem:[%s1858_s5 + $0x18] sm:$0xff] %vm389_vm2, %v332_v46 }
 0x160   :  { %v498_v50 = vpop.xlane.xlu0 %497  ;;  %v364_v53 = vpop.xlane.xlu1 %363 }
 0x161   :  { %543 = vst.msk [vmem:[%s1859_s6 + $0x90] sm:$0xff] %vm389_vm2, %v498_v50  ;;  %409 = vst.msk [vmem:[%s1858_s5 + $0x98] sm:$0xff] %vm389_vm2, %v364_v53 }
 0x164   :  { %v326_v54 = vpop.xlane.xlu0 %325  ;;  %v468_v57 = vpop.xlane.xlu1 %467 }
 0x165   :  { %390 = vst.msk [vmem:[%s1858_s5] sm:$0xff] %vm389_vm2, %v326_v54  ;;  %528 = vst.msk [vmem:[%s1859_s6 + $0x18] sm:$0xff] %vm389_vm2, %v468_v57 }
 0x168   :  { %v358_v58 = vpop.xlane.xlu0 %357  ;;  %v500_v2 = vpop.xlane.xlu1 %499 }
 0x169   :  { %406 = vst.msk [vmem:[%s1858_s5 + $0x80] sm:$0xff] %vm389_vm2, %v358_v58  ;;  %544 = vst.msk [vmem:[%s1859_s6 + $0x98] sm:$0xff] %vm389_vm2, %v500_v2 }
 0x16c   :  { %v462_v4 = vpop.xlane.xlu0 %461  ;;  %v360_v13 = vpop.xlane.xlu1 %359 }
 0x16d   :  { %525 = vst.msk [vmem:[%s1859_s6] sm:$0xff] %vm389_vm2, %v462_v4  ;;  %407 = vst.msk [vmem:[%s1858_s5 + $0x88] sm:$0xff] %vm389_vm2, %v360_v13 }
 0x170   :  { %v494_v14 = vpop.xlane.xlu0 %493  ;;  %v464_v17 = vpop.xlane.xlu1 %463 }
 0x171   :  { %541 = vst.msk [vmem:[%s1859_s6 + $0x80] sm:$0xff] %vm389_vm2, %v494_v14  ;;  %526 = vst.msk [vmem:[%s1859_s6 + $0x8] sm:$0xff] %vm389_vm2, %v464_v17 }
 0x174   :  { %v496_v20 = vpop.xlane.xlu1 %495  ;;  %v328_v62 = vpop.xlane.xlu0 %327 }
 0x175   :  { %542 = vst.msk [vmem:[%s1859_s6 + $0x88] sm:$0xff] %vm389_vm2, %v496_v20  ;;  %391 = vst.msk [vmem:[%s1858_s5 + $0x8] sm:$0xff] %vm389_vm2, %v328_v62 }
 0x178   :  { %v338_v27 = vpop.xlane.xlu0 %337  ;;  %v340_v10 = vpop.xlane.xlu1 %339 }
 0x179   :  { %396 = vst.msk [vmem:[%s1858_s5 + $0x30] sm:$0xff] %vm389_vm2, %v338_v27  ;;  %397 = vst.msk [vmem:[%s1858_s5 + $0x38] sm:$0xff] %vm389_vm2, %v340_v10 }
 0x17c   :  { %v370_v31 = vpop.xlane.xlu0 %369  ;;  %v372_v38 = vpop.xlane.xlu1 %371 }
 0x17d   :  { %412 = vst.msk [vmem:[%s1858_s5 + $0xb0] sm:$0xff] %vm389_vm2, %v370_v31  ;;  %413 = vst.msk [vmem:[%s1858_s5 + $0xb8] sm:$0xff] %vm389_vm2, %v372_v38 }
 0x180   :  { %v474_v39 = vpop.xlane.xlu0 %473  ;;  %v476_v44 = vpop.xlane.xlu1 %475 }
 0x181   :  { %531 = vst.msk [vmem:[%s1859_s6 + $0x30] sm:$0xff] %vm389_vm2, %v474_v39  ;;  %532 = vst.msk [vmem:[%s1859_s6 + $0x38] sm:$0xff] %vm389_vm2, %v476_v44 }
 0x184   :  { %v506_v45 = vpop.xlane.xlu0 %505  ;;  %v508_v47 = vpop.xlane.xlu1 %507 }
 0x185   :  { %547 = vst.msk [vmem:[%s1859_s6 + $0xb0] sm:$0xff] %vm389_vm2, %v506_v45  ;;  %548 = vst.msk [vmem:[%s1859_s6 + $0xb8] sm:$0xff] %vm389_vm2, %v508_v47 }
 0x188   :  { %v334_v48 = vpop.xlane.xlu0 %333  ;;  %v336_v49 = vpop.xlane.xlu1 %335 }
 0x189   :  { %394 = vst.msk [vmem:[%s1858_s5 + $0x20] sm:$0xff] %vm389_vm2, %v334_v48  ;;  %395 = vst.msk [vmem:[%s1858_s5 + $0x28] sm:$0xff] %vm389_vm2, %v336_v49 }
 0x18c   :  { %v366_v51 = vpop.xlane.xlu0 %365  ;;  %v368_v52 = vpop.xlane.xlu1 %367 }
 0x18d   :  { %410 = vst.msk [vmem:[%s1858_s5 + $0xa0] sm:$0xff] %vm389_vm2, %v366_v51  ;;  %411 = vst.msk [vmem:[%s1858_s5 + $0xa8] sm:$0xff] %vm389_vm2, %v368_v52 }
 0x190   :  { %v470_v59 = vpop.xlane.xlu0 %469  ;;  %v472_v60 = vpop.xlane.xlu1 %471 }
 0x191   :  { %529 = vst.msk [vmem:[%s1859_s6 + $0x20] sm:$0xff] %vm389_vm2, %v470_v59  ;;  %530 = vst.msk [vmem:[%s1859_s6 + $0x28] sm:$0xff] %vm389_vm2, %v472_v60 }
 0x194   :  { %v502_v61 = vpop.xlane.xlu0 %501  ;;  %v504_v0 = vpop.xlane.xlu1 %503 }
 0x195   :  { %545 = vst.msk [vmem:[%s1859_s6 + $0xa0] sm:$0xff] %vm389_vm2, %v502_v61  ;;  %546 = vst.msk [vmem:[%s1859_s6 + $0xa8] sm:$0xff] %vm389_vm2, %v504_v0 }
 0x198   :  { %v346_v1 = vpop.xlane.xlu0 %345  ;;  %v348_v3 = vpop.xlane.xlu1 %347 }
 0x199   :  { %400 = vst.msk [vmem:[%s1858_s5 + $0x50] sm:$0xff] %vm389_vm2, %v346_v1  ;;  %401 = vst.msk [vmem:[%s1858_s5 + $0x58] sm:$0xff] %vm389_vm2, %v348_v3 }
 0x19c   :  { %v378_v5 = vpop.xlane.xlu0 %377  ;;  %v380_v6 = vpop.xlane.xlu1 %379 }
 0x19d   :  { %416 = vst.msk [vmem:[%s1858_s5 + $0xd0] sm:$0xff] %vm389_vm2, %v378_v5  ;;  %417 = vst.msk [vmem:[%s1858_s5 + $0xd8] sm:$0xff] %vm389_vm2, %v380_v6 }
 0x1a0   :  { %v482_v7 = vpop.xlane.xlu0 %481  ;;  %v484_v55 = vpop.xlane.xlu1 %483 }
 0x1a1   :  { %535 = vst.msk [vmem:[%s1859_s6 + $0x50] sm:$0xff] %vm389_vm2, %v482_v7  ;;  %536 = vst.msk [vmem:[%s1859_s6 + $0x58] sm:$0xff] %vm389_vm2, %v484_v55 }
 0x1a4   :  { %v514_v8 = vpop.xlane.xlu0 %513  ;;  %v516_v9 = vpop.xlane.xlu1 %515 }
 0x1a5   :  { %551 = vst.msk [vmem:[%s1859_s6 + $0xd0] sm:$0xff] %vm389_vm2, %v514_v8  ;;  %552 = vst.msk [vmem:[%s1859_s6 + $0xd8] sm:$0xff] %vm389_vm2, %v516_v9 }
 0x1a8   :  { %v342_v12 = vpop.xlane.xlu0 %341  ;;  %v344_v15 = vpop.xlane.xlu1 %343 }
 0x1a9   :  { %398 = vst.msk [vmem:[%s1858_s5 + $0x40] sm:$0xff] %vm389_vm2, %v342_v12  ;;  %399 = vst.msk [vmem:[%s1858_s5 + $0x48] sm:$0xff] %vm389_vm2, %v344_v15 }
 0x1ac   :  { %v374_v16 = vpop.xlane.xlu0 %373  ;;  %v376_v21 = vpop.xlane.xlu1 %375 }
 0x1ad   :  { %414 = vst.msk [vmem:[%s1858_s5 + $0xc0] sm:$0xff] %vm389_vm2, %v374_v16  ;;  %415 = vst.msk [vmem:[%s1858_s5 + $0xc8] sm:$0xff] %vm389_vm2, %v376_v21 }
 0x1b0   :  { %v478_v24 = vpop.xlane.xlu0 %477  ;;  %v480_v25 = vpop.xlane.xlu1 %479 }
 0x1b1   :  { %533 = vst.msk [vmem:[%s1859_s6 + $0x40] sm:$0xff] %vm389_vm2, %v478_v24  ;;  %534 = vst.msk [vmem:[%s1859_s6 + $0x48] sm:$0xff] %vm389_vm2, %v480_v25 }
 0x1b4   :  { %v510_v26 = vpop.xlane.xlu0 %509  ;;  %v512_v18 = vpop.xlane.xlu1 %511 }
 0x1b5   :  { %549 = vst.msk [vmem:[%s1859_s6 + $0xc0] sm:$0xff] %vm389_vm2, %v510_v26  ;;  %550 = vst.msk [vmem:[%s1859_s6 + $0xc8] sm:$0xff] %vm389_vm2, %v512_v18 }
 0x1b8   :  { %v354_v28 = vpop.xlane.xlu0 %353  ;;  %v356_v19 = vpop.xlane.xlu1 %355 }
 0x1b9   :  { %404 = vst.msk [vmem:[%s1858_s5 + $0x70] sm:$0xff] %vm389_vm2, %v354_v28  ;;  %405 = vst.msk [vmem:[%s1858_s5 + $0x78] sm:$0xff] %vm389_vm2, %v356_v19 }
 0x1bc   :  { %v386_v29 = vpop.xlane.xlu0 %385  ;;  %v388_v30 = vpop.xlane.xlu1 %387 }
 0x1bd   :  { %420 = vst.msk [vmem:[%s1858_s5 + $0xf0] sm:$0xff] %vm389_vm2, %v386_v29  ;;  %421 = vst.msk [vmem:[%s1858_s5 + $0xf8] sm:$0xff] %vm389_vm2, %v388_v30 }
 0x1c0   :  { %v490_v11 = vpop.xlane.xlu0 %489  ;;  %v492_v32 = vpop.xlane.xlu1 %491 }
 0x1c1   :  { %539 = vst.msk [vmem:[%s1859_s6 + $0x70] sm:$0xff] %vm389_vm2, %v490_v11  ;;  %540 = vst.msk [vmem:[%s1859_s6 + $0x78] sm:$0xff] %vm389_vm2, %v492_v32 }
 0x1c4   :  { %v350_v33 = vpop.xlane.xlu0 %349  ;;  %v352_v22 = vpop.xlane.xlu1 %351 }
 0x1c5   :  { %402 = vst.msk [vmem:[%s1858_s5 + $0x60] sm:$0xff] %vm389_vm2, %v350_v33  ;;  %403 = vst.msk [vmem:[%s1858_s5 + $0x68] sm:$0xff] %vm389_vm2, %v352_v22 }
 0x1c8   :  { %v382_v35 = vpop.xlane.xlu0 %381  ;;  %v384_v23 = vpop.xlane.xlu1 %383 }
 0x1c9   :  { %418 = vst.msk [vmem:[%s1858_s5 + $0xe0] sm:$0xff] %vm389_vm2, %v382_v35  ;;  %419 = vst.msk [vmem:[%s1858_s5 + $0xe8] sm:$0xff] %vm389_vm2, %v384_v23 }
 0x1cc   :  { %v486_v37 = vpop.xlane.xlu0 %485  ;;  %v488_v34 = vpop.xlane.xlu1 %487 }
 0x1cd   :  { %537 = vst.msk [vmem:[%s1859_s6 + $0x60] sm:$0xff] %vm389_vm2, %v486_v37  ;;  %538 = vst.msk [vmem:[%s1859_s6 + $0x68] sm:$0xff] %vm389_vm2, %v488_v34 }
 0x1d0   :  { %v518_v36 = vpop.xlane.xlu0 %517  ;;  %v520_v40 = vpop.xlane.xlu1 %519 }
 0x1d1   :  { %553 = vst.msk [vmem:[%s1859_s6 + $0xe0] sm:$0xff] %vm389_vm2, %v518_v36  ;;  %554 = vst.msk [vmem:[%s1859_s6 + $0xe8] sm:$0xff] %vm389_vm2, %v520_v40 }
 0x1d4   :  { %v522_v41 = vpop.xlane.xlu0 %521  ;;  %v524_v42 = vpop.xlane.xlu1 %523 }
 0x1d5   :  { %555 = vst.msk [vmem:[%s1859_s6 + $0xf0] sm:$0xff] %vm389_vm2, %v522_v41  ;;  %556 = vst.msk [vmem:[%s1859_s6 + $0xf8] sm:$0xff] %vm389_vm2, %v524_v42 }
 0x1d6   :  { %1131 = dma.done.wait [#allocation3], 2048  }
 0x1d7   :  { %1132 = vsyncadd [#allocation3], 4294965248 }
 0x1d8   :  { %872 = vsyncpa [#allocation3], 1 }

</bundles_post_ra>
